<compile_context>
chip_gen: v7x
topology: tpu7x:2x2x1
jax: 0.10.0
libtpu: 0.0.40
codegen_flags: <defaults>
</compile_context>

<pallas_src>
import functools

import jax
import jax.numpy as jnp
from jax.experimental import pallas as pl
from jax.experimental.pallas import tpu as pltpu

_LANE = 128
_SUB = 8


def _round_up(x, m):
    return ((x + m - 1) // m) * m


def _smooth_l1(pred, target, beta):
    diff = jnp.abs(pred - target)
    return jnp.where(diff < beta, (0.5 / beta) * diff * diff, diff - 0.5 * beta)


# ---------------------------------------------------------------------------
# Kernels
# ---------------------------------------------------------------------------
def _none_kernel(pred_ref, tgt_ref, out_ref, *, beta, scale):
    loss = _smooth_l1(pred_ref[...].astype(jnp.float32),
                      tgt_ref[...].astype(jnp.float32), beta)
    out_ref[...] = (scale * loss).astype(out_ref.dtype)


def _none_w_kernel(pred_ref, tgt_ref, w_ref, out_ref, *, beta, scale):
    loss = _smooth_l1(pred_ref[...].astype(jnp.float32),
                      tgt_ref[...].astype(jnp.float32), beta)
    loss = loss * w_ref[...].astype(jnp.float32)
    out_ref[...] = (scale * loss).astype(out_ref.dtype)


def _sum_kernel(pred_ref, tgt_ref, out_ref, acc_ref, *, beta):
    j = pl.program_id(1)

    @pl.when(j == 0)
    def _():
        acc_ref[...] = jnp.zeros_like(acc_ref)

    acc_ref[...] += _smooth_l1(pred_ref[...].astype(jnp.float32),
                               tgt_ref[...].astype(jnp.float32), beta)

    @pl.when(j == pl.num_programs(1) - 1)
    def _():
        out_ref[...] = jnp.full(out_ref.shape, jnp.sum(acc_ref[...]),
                                dtype=out_ref.dtype)


def _sum_w_kernel(pred_ref, tgt_ref, w_ref, out_ref, acc_ref, *, beta):
    j = pl.program_id(1)

    @pl.when(j == 0)
    def _():
        acc_ref[...] = jnp.zeros_like(acc_ref)

    loss = _smooth_l1(pred_ref[...].astype(jnp.float32),
                      tgt_ref[...].astype(jnp.float32), beta)
    acc_ref[...] += loss * w_ref[...].astype(jnp.float32)

    @pl.when(j == pl.num_programs(1) - 1)
    def _():
        out_ref[...] = jnp.full(out_ref.shape, jnp.sum(acc_ref[...]),
                                dtype=out_ref.dtype)


# ---------------------------------------------------------------------------
# Layout helpers
# ---------------------------------------------------------------------------
def _none_layout(n_elems, max_rows=2048):
    rows = _round_up((n_elems + _LANE - 1) // _LANE, _SUB)
    tb = min(max_rows, rows)
    rows = _round_up(rows, tb)
    return rows, tb, rows // tb


def _sum_layout(n_elems, max_rows=1024):
    rows = _round_up((n_elems + _LANE - 1) // _LANE, _SUB)
    half = _round_up((rows + 1) // 2, _SUB)      # rows per half (v7x 2-core split)
    tb = min(max_rows, half)
    half = _round_up(half, tb)
    n_blk = half // tb
    return 2 * half, tb, n_blk


def _flat_pad(x, total_elems):
    flat = x.reshape(-1)
    pad = total_elems - flat.shape[0]
    if pad:
        flat = jnp.pad(flat, (0, pad))
    return flat.reshape(-1, _LANE)


# ---------------------------------------------------------------------------
# Module
# ---------------------------------------------------------------------------
class SmoothL1Loss:
    """JAX / Pallas re-implementation of easycv SmoothL1Loss.forward."""

    def __init__(self, beta=1.0, reduction='mean', loss_weight=1.0):
        assert beta > 0
        self.beta = float(beta)
        self.reduction = reduction
        self.loss_weight = float(loss_weight)

    def __call__(self, pred, target, weight=None, avg_factor=None,
                 reduction_override=None):
        assert reduction_override in (None, 'none', 'mean', 'sum')
        reduction = reduction_override if reduction_override else self.reduction
        assert pred.shape == target.shape
        if avg_factor is not None and reduction == 'sum':
            raise ValueError('avg_factor can not be used with reduction="sum"')

        if pred.size == 0:
            # torch: return pred.sum() * 0
            return jnp.zeros((), dtype=pred.dtype)

        L = pred.size

        # Per-element weight (only materialized when a weight is given).
        if weight is not None:
            if weight.ndim == 1 and pred.ndim > 1 and weight.shape[0] == pred.shape[0]:
                weight = weight.reshape((-1,) + (1,) * (pred.ndim - 1))
            weight = jnp.broadcast_to(weight, pred.shape).astype(pred.dtype)

        if reduction == 'none':
            M, tb, n_blk = _none_layout(L)
            inputs = [_flat_pad(pred, M * _LANE), _flat_pad(target, M * _LANE)]
            if weight is None:
                kern = functools.partial(_none_kernel, beta=self.beta,
                                         scale=self.loss_weight)
            else:
                kern = functools.partial(_none_w_kernel, beta=self.beta,
                                         scale=self.loss_weight)
                inputs.append(_flat_pad(weight, M * _LANE))
            spec = pl.BlockSpec((tb, _LANE), lambda i: (i, 0))
            out = pl.pallas_call(
                kern,
                out_shape=jax.ShapeDtypeStruct((M, _LANE), pred.dtype),
                grid=(n_blk,),
                in_specs=[spec] * len(inputs),
                out_specs=spec,
                compiler_params=pltpu.CompilerParams(
                    dimension_semantics=("parallel",)),
            )(*inputs)
            if M * _LANE == L:
                return out.reshape(pred.shape)
            return out.reshape(-1)[:L].reshape(pred.shape)

        # 'sum' / 'mean'
        M, tb, n_blk = _sum_layout(L)
        inputs = [_flat_pad(pred, M * _LANE), _flat_pad(target, M * _LANE)]
        if weight is None:
            kern = functools.partial(_sum_kernel, beta=self.beta)
        else:
            kern = functools.partial(_sum_w_kernel, beta=self.beta)
            inputs.append(_flat_pad(weight, M * _LANE))

        in_spec = pl.BlockSpec((tb, _LANE), lambda c, j: (c * n_blk + j, 0))
        partials = pl.pallas_call(
            kern,
            out_shape=jax.ShapeDtypeStruct((2 * _SUB, _LANE), jnp.float32),
            grid=(2, n_blk),
            in_specs=[in_spec] * len(inputs),
            out_specs=pl.BlockSpec((_SUB, _LANE), lambda c, j: (c, 0)),
            scratch_shapes=[pltpu.VMEM((tb, _LANE), jnp.float32)],
            compiler_params=pltpu.CompilerParams(
                dimension_semantics=("parallel", "arbitrary")),
        )(*inputs)
        total = partials[0, 0] + partials[_SUB, 0]

        if reduction == 'sum':
            return (self.loss_weight * total).astype(pred.dtype)

        # 'mean': sum / avg_factor if given, else mean over all elements.
        denom = jnp.asarray(L, jnp.float32) if avg_factor is None else avg_factor
        return (self.loss_weight * total / denom).astype(pred.dtype)


# ---------------------------------------------------------------------------
# Reference + self-test
# ---------------------------------------------------------------------------
def _reference(pred, target, weight, beta, reduction, avg_factor, loss_weight):
    diff = jnp.abs(pred - target)
    loss = jnp.where(diff < beta, 0.5 * diff * diff / beta, diff - 0.5 * beta)
    if weight is not None:
        w = weight.reshape((-1,) + (1,) * (pred.ndim - 1)) if weight.ndim == 1 else weight
        loss = loss * w
    if reduction == 'none':
        return loss_weight * loss
    s = jnp.sum(loss)
    if reduction == 'sum':
        return loss_weight * s
    denom = pred.size if avg_factor is None else avg_factor
    return loss_weight * s / denom


if __name__ == "__main__":
    key = jax.random.PRNGKey(0)
    k1, k2, k3 = jax.random.split(key, 3)

    N, C = 10, 4  # (N, 4) bbox deltas; N deliberately not a multiple of 8
    pred = jax.random.normal(k1, (N, C), dtype=jnp.float32)
    target = jax.random.normal(k2, (N, C), dtype=jnp.float32) * 2.0
    weight = jax.random.uniform(k3, (N,), dtype=jnp.float32)

    loss_mod = SmoothL1Loss(beta=1.0, reduction='mean', loss_weight=1.0)

    # mean reduction (default), per-row weight
    out_mean = loss_mod(pred, target, weight=weight)
    jax.block_until_ready(out_mean)
    ref_mean = _reference(pred, target, weight, 1.0, 'mean', None, 1.0)
    assert jnp.allclose(out_mean, ref_mean, rtol=1e-5, atol=1e-6)

    # sum reduction, no weight (exercises the weight-less kernel variant)
    out_sum = loss_mod(pred, target, reduction_override='sum')
    jax.block_until_ready(out_sum)
    ref_sum = _reference(pred, target, None, 1.0, 'sum', None, 1.0)
    assert jnp.allclose(out_sum, ref_sum, rtol=1e-5, atol=1e-5)

    # 'none' reduction (elementwise), weighted
    out_none = loss_mod(pred, target, weight=weight, reduction_override='none')
    jax.block_until_ready(out_none)
    ref_none = _reference(pred, target, weight, 1.0, 'none', None, 1.0)
    assert out_none.shape == (N, C)
    assert jnp.allclose(out_none, ref_none, rtol=1e-5, atol=1e-6)

    # mean with explicit avg_factor
    out_af = loss_mod(pred, target, weight=weight, avg_factor=7.0)
    jax.block_until_ready(out_af)
    ref_af = _reference(pred, target, weight, 1.0, 'mean', 7.0, 1.0)
    assert jnp.allclose(out_af, ref_af, rtol=1e-5, atol=1e-6)

    # non-default beta / loss_weight
    loss_mod2 = SmoothL1Loss(beta=0.5, reduction='mean', loss_weight=2.0)
    out2 = loss_mod2(pred, target)
    jax.block_until_ready(out2)
    ref2 = _reference(pred, target, None, 0.5, 'mean', None, 2.0)
    assert jnp.allclose(out2, ref2, rtol=1e-5, atol=1e-6)

    print("KERNEL_OK")
</pallas_src>

<mosaic_0001>
module attributes {stable_mosaic.version = 11 : i64} {
  func.func @_sum_w_kernel(%arg0: i32, %arg1: i32, %arg2: memref<8x128xf32, #tpu.memory_space<vmem>>, %arg3: memref<8x128xf32, #tpu.memory_space<vmem>>, %arg4: memref<8x128xf32, #tpu.memory_space<vmem>>, %arg5: memref<8x128xf32, #tpu.memory_space<vmem>>, %arg6: memref<8x128xf32, #tpu.memory_space<vmem>>) attributes {dimension_semantics = [#tpu.dimension_semantics<parallel>, #tpu.dimension_semantics<arbitrary>], iteration_bounds = array<i64: 2, 1>, scalar_prefetch = 0 : i64, scratch_operands = 1 : i64, tpu.core_type = #tpu.core_type<tc>, window_params = [{transform_indices = @transform_0, window_bounds = array<i64: 8, 128>}, {transform_indices = @transform_1, window_bounds = array<i64: 8, 128>}, {transform_indices = @transform_2, window_bounds = array<i64: 8, 128>}, {transform_indices = @transform_3, window_bounds = array<i64: 8, 128>}]} {
    %c0_i32 = arith.constant 0 : i32
    %0 = arith.cmpi eq, %arg1, %c0_i32 : i32
    %1 = arith.extui %0 : i1 to i32
    %c0_i32_0 = arith.constant 0 : i32
    %2 = arith.cmpi ne, %1, %c0_i32_0 : i32
    scf.if %2 {
      %cst_14 = arith.constant 0.000000e+00 : f32
      %23 = vector.broadcast %cst_14 : f32 to vector<8x128xf32>
      %c0_15 = arith.constant 0 : index
      %c0_16 = arith.constant 0 : index
      %24 = vector.load %arg6[%c0_15, %c0_16] : memref<8x128xf32, #tpu.memory_space<vmem>>, vector<8x128xf32>
      tpu.vector_store %arg6[%c0_15, %c0_16], %23 {strides = array<i32>} : memref<8x128xf32, #tpu.memory_space<vmem>>, vector<8x128xf32>,
    } else {
    }
    %c0 = arith.constant 0 : index
    %c0_1 = arith.constant 0 : index
    %3 = vector.load %arg2[%c0, %c0_1] : memref<8x128xf32, #tpu.memory_space<vmem>>, vector<8x128xf32>
    %c0_2 = arith.constant 0 : index
    %c0_3 = arith.constant 0 : index
    %4 = vector.load %arg3[%c0_2, %c0_3] : memref<8x128xf32, #tpu.memory_space<vmem>>, vector<8x128xf32>
    %5 = arith.subf %3, %4 : vector<8x128xf32>
    %6 = math.absf %5 : vector<8x128xf32>
    %cst = arith.constant 1.000000e+00 : f32
    %7 = vector.broadcast %cst : f32 to vector<8x128xf32>
    %8 = arith.cmpf olt, %6, %7 : vector<8x128xf32>
    %cst_4 = arith.constant 5.000000e-01 : f32
    %9 = vector.broadcast %cst_4 : f32 to vector<8x128xf32>
    %10 = arith.mulf %9, %6 : vector<8x128xf32>
    %11 = arith.mulf %10, %6 : vector<8x128xf32>
    %cst_5 = arith.constant 5.000000e-01 : f32
    %12 = vector.broadcast %cst_5 : f32 to vector<8x128xf32>
    %13 = arith.subf %6, %12 : vector<8x128xf32>
    %14 = arith.select %8, %11, %13 : vector<8x128xi1>, vector<8x128xf32>
    %c0_6 = arith.constant 0 : index
    %c0_7 = arith.constant 0 : index
    %15 = vector.load %arg6[%c0_6, %c0_7] : memref<8x128xf32, #tpu.memory_space<vmem>>, vector<8x128xf32>
    %c0_8 = arith.constant 0 : index
    %c0_9 = arith.constant 0 : index
    %16 = vector.load %arg4[%c0_8, %c0_9] : memref<8x128xf32, #tpu.memory_space<vmem>>, vector<8x128xf32>
    %17 = arith.mulf %14, %16 : vector<8x128xf32>
    %18 = arith.addf %15, %17 : vector<8x128xf32>
    %c0_10 = arith.constant 0 : index
    %c0_11 = arith.constant 0 : index
    %19 = vector.load %arg6[%c0_10, %c0_11] : memref<8x128xf32, #tpu.memory_space<vmem>>, vector<8x128xf32>
    tpu.vector_store %arg6[%c0_10, %c0_11], %18 {strides = array<i32>} : memref<8x128xf32, #tpu.memory_space<vmem>>, vector<8x128xf32>,
    %c0_i32_12 = arith.constant 0 : i32
    %20 = arith.cmpi eq, %arg1, %c0_i32_12 : i32
    %21 = arith.extui %20 : i1 to i32
    %c0_i32_13 = arith.constant 0 : i32
    %22 = arith.cmpi ne, %21, %c0_i32_13 : i32
    scf.if %22 {
      %c0_14 = arith.constant 0 : index
      %c0_15 = arith.constant 0 : index
      %23 = vector.load %arg6[%c0_14, %c0_15] : memref<8x128xf32, #tpu.memory_space<vmem>>, vector<8x128xf32>
      %24 = vector.shape_cast %23 : vector<8x128xf32> to vector<1x8x128xf32>
      %cst_16 = arith.constant dense<0.000000e+00> : vector<1xf32>
      %25 = vector.multi_reduction <add>, %24, %cst_16 [1, 2] : vector<1x8x128xf32> to vector<1xf32>
      %26 = vector.shape_cast %25 : vector<1xf32> to vector<1x1x1xf32>
      %27 = vector.extract %26[0, 0, 0] : f32 from vector<1x1x1xf32>
      %28 = vector.broadcast %27 : f32 to vector<8x128xf32>
      %c0_17 = arith.constant 0 : index
      %c0_18 = arith.constant 0 : index
      %29 = vector.load %arg5[%c0_17, %c0_18] : memref<8x128xf32, #tpu.memory_space<vmem>>, vector<8x128xf32>
      tpu.vector_store %arg5[%c0_17, %c0_18], %28 {strides = array<i32>} : memref<8x128xf32, #tpu.memory_space<vmem>>, vector<8x128xf32>,
    } else {
    }
    return
  }
  func.func @transform_0(%arg0: i32, %arg1: i32) -> (i32, i32) {
    %c1_i32 = arith.constant 1 : i32
    %0 = arith.muli %arg0, %c1_i32 : i32
    %1 = arith.addi %0, %arg1 : i32
    %c0_i32 = arith.constant 0 : i32
    %c0_i32_0 = arith.constant 0 : i32
    return %1, %c0_i32 : i32, i32
  }
  func.func @transform_1(%arg0: i32, %arg1: i32) -> (i32, i32) {
    %c1_i32 = arith.constant 1 : i32
    %0 = arith.muli %arg0, %c1_i32 : i32
    %1 = arith.addi %0, %arg1 : i32
    %c0_i32 = arith.constant 0 : i32
    %c0_i32_0 = arith.constant 0 : i32
    return %1, %c0_i32 : i32, i32
  }
  func.func @transform_2(%arg0: i32, %arg1: i32) -> (i32, i32) {
    %c1_i32 = arith.constant 1 : i32
    %0 = arith.muli %arg0, %c1_i32 : i32
    %1 = arith.addi %0, %arg1 : i32
    %c0_i32 = arith.constant 0 : i32
    %c0_i32_0 = arith.constant 0 : i32
    return %1, %c0_i32 : i32, i32
  }
  func.func @transform_3(%arg0: i32, %arg1: i32) -> (i32, i32) {
    %c0_i32 = arith.constant 0 : i32
    %c0_i32_0 = arith.constant 0 : i32
    return %arg0, %c0_i32 : i32, i32
  }
}

</mosaic_0001>

<bundles_post_ra>
// kernel: tpu_custom_call.1
= control target key start
LH: loop header
LB: loop body
LE: loop exit
PB: predicated region body
PF: predicated region fallthrough
CT: control target
= control target key end

     0   :  { %s1013_s0 = inlined_call_operand.hbm [shape: f32[16,128], index: 0, kind: input, shape index: {}]   ;;  %s1014_s1 = inlined_call_operand.hbm [shape: f32[16,128], index: 1, kind: input, shape index: {}]   ;;  %s1015_s2 = inlined_call_operand.hbm [shape: f32[16,128], index: 2, kind: input, shape index: {}]   ;;  %s1016_s3 = inlined_call_operand.hbm [shape: f32[16,128], index: 3, kind: output, shape index: {}]  }
   0x1   :  { %1022 = sst [smem:[#allocation16_spill]] %s1014_s1 }
   0x2   :  { %8 = vsyncpa [#allocation4], 0 }
   0x3   :  { %10 = vsyncpa [#allocation4 + $0x1], 0 }
   0x4   :  { %11 = vsyncpa [#allocation7], 0 }
   0x5   :  { %13 = vsyncpa [#allocation7 + $0x1], 0 }
   0x6   :  { %14 = vsyncpa [#allocation5], 0 }
   0x7   :  { %16 = vsyncpa [#allocation5 + $0x1], 0  ;;  %s749_s12 = smov 0   ;;  %s751_s13 = smov 0  }
   0x8   :  { %s753_s14 = smov 0   ;;  %s755_s15 = smov 0  }
   0x9   :  { %s757_s16 = smov 0   ;;  %s759_s17 = smov 0  }
   0xa LB: > { %1023 = sst [smem:[#allocation13_spill]] %s719_s16  ;;  %s780_s18 = sadd.s32 4294967295, %s723_s17   ;;  %s723_s17 = sphi %s759_s17, %s22_s17   ;;  %s719_s16 = sphi %s757_s16, %s1044_s16   ;;  %s715_s15 = sphi %s755_s15, %s1043_s15   ;;  %s711_s14 = sphi %s753_s14, %s1047_s14   ;;  %s707_s13 = sphi %s751_s13, %s1046_s13   ;;  %s703_s12 = sphi %s749_s12, %s1045_s12  }
   0xb   : > { %s454_s19 = sadd.s32 4294967294, %s723_s17   ;;  %s34_s20 = sadd.s32 1, %s719_s16 }
   0xc   : > { %s43_s21 = sadd.s32 1, %s711_s14  ;;  %p36_p0 = scmp.ge.s32.totalorder %s34_s20, 2 }
   0xd   : > { %p50_p1 = scmp.ne.s32.totalorder %s711_s14, %s707_s13  ;;  %p51_p2 = scmp.eq.s32.totalorder %s723_s17, 0 }
   0xe   : > { %p56_p3 = scmp.ne.s32.totalorder %s707_s13, %s703_s12  ;;  %s1049_s20 = smov (%p36_p0, %s34_s20), 0 }
   0xf   : > { %1024 = sst [smem:[#allocation14_spill]] %s1049_s20  ;;  %p792_p4 = por %p51_p2, %p50_p1 }
  0x10   : > { %p57_p5 = scmp.eq.s32.totalorder %s780_s18, 0  ;;  %s40_s23 = ssub.s32 %s719_s16, %s1049_s20 }
  0x11   : > { %p136_p6 = scmp.eq.s32.totalorder %s780_s18, 1  ;;  %p41_p7 = scmp.eq.s32.totalorder %s40_s23, 0 }
  0x12   : > { %p800_p8 = por %p57_p5, %p56_p3  ;;  %p142_p10 = scmp.eq.s32.totalorder %s454_s19, 1 }
  0x13   : > { %p804_p9 = por %p136_p6, %p50_p1  ;;  %p497_p13 = scmp.lt.s32.totalorder %s723_s17, 2 }
  0x14   : > { %s1026_s24 = scalar_select %p800_p8, 1, 0 }
  0x15   : > { %s1027_s25 = scalar_select %p804_p9, 1, 0 }
  0x16   : > { %s809_s26 = scalar_select %p41_p7, %s711_s14, %s43_s21  }
  0x17   : > { %p811_p11 = por %p142_p10, %p56_p3  ;;  %s162_s28 = sand.u32 1, %s711_s14  }
  0x18   : > { %1028 = sst [smem:[#allocation15_spill]] %s809_s26  ;;  %s820_s29 = sshll.u32 %s162_s28, 3 }
  0x19   : > { %s1029_s27 = scalar_select %p811_p11, 1, 0 }
  0x1a   : > { %s823_s30 = sshll.u32 %s719_s16, 7  ;;  %p827_p0 = pnand %p497_p13, %p792_p4 }
  0x1b   : > { %s181_s5 = sand.u32 1, %s723_s17   ;;  %s1031_s1 = sld [smem:[#allocation16_spill]] }
  0x1c   : > { %s1030_s4 = scalar_select %p827_p0, 1, 0 }
  0x1d   : > { %s185_s9 = scalar_lea.vmem [#allocation6], %s820_s29  ;;  %s843_s11 = scalar_lea.sflag [#allocation7], %s181_s5 }
  0x1e   : > { %s193_s10 = sshll.u32 %s185_s9, 4  ;;  %p849_p4 = pneg %p827_p0  ;;  %s840_s10 = int_to_ptr.vmem [resolvable:$true] %s193_s10 }
  0x21   : > { %s836_s8 = scalar_lea.hbm %s1031_s1, %s823_s30  ;;  %s552_s6 = scalar_lea.hbm %s1031_s1, 256 }
  0x22   : > { %s547_s19 = scalar_lea.hbm %s836_s8, 128  ;;  %p553_p7 = scmp.lt.u32.totalorder %s836_s8, %s1031_s1 }
  0x23   : > { %p548_p3 = scmp.ne.s32.totalorder %s836_s8, %s547_s19  ;;  %p554_p10 = scmp.lt.u32.totalorder %s552_s6, %s547_s19 }
  0x24   : > { %p556_p12 = scmp.lt.u32.totalorder %s547_s19, %s836_s8 }
  0x25   : > { %p550_p5 = pnand %p849_p4, %p548_p3  ;;  %p555_p13 = por %p554_p10, %p553_p7 }
  0x27   : > { %p551_p6 = pneg %p550_p5  ;;  %p557_p1 = por %p556_p12, %p555_p13 }
  0x29   : > { %p558_p2 = pnand %p557_p1, %p551_p6 }
  0x2b   : > { %561 = shalt.err (!%p558_p2)
}
  0x2c   : > { %s562_s5 = scalar_lea.vmem %s840_s10, 128  ;;  %s725_s22 = smov [#allocation6]  }
  0x2d   : > { %p563_p3 = scmp.ne.s32.totalorder %s840_s10, %s562_s5  ;;  %s567_s23 = sshll.u32 %s725_s22, 4  ;;  %s568_s23 = int_to_ptr.vmem [resolvable:$false] %s567_s23 }
  0x2e   : > { %s569_s7 = scalar_lea.vmem %s568_s23, 256  ;;  %p570_p9 = scmp.lt.s32.totalorder %s840_s10, %s568_s23 }
  0x2f   : > { %p565_p5 = pnand %p563_p3, %p849_p4  ;;  %p571_p8 = scmp.lt.s32.totalorder %s569_s7, %s562_s5 }
  0x31   : > { %p566_p11 = pneg %p565_p5  ;;  %p572_p7 = por %p571_p8, %p570_p9 }
  0x33   : > { %p573_p10 = pnand %p572_p7, %p566_p11 }
  0x35   : > { %576 = shalt.err (!%p573_p10)
}
  0x36   : > { %489 = dma.hbm_to_vmem [thread:$0]  (!%p827_p0), %s836_s8, 128, %s840_s10, %s843_s11  }
  0x37   : > { %p1033_p12 = scmp.lt.s32.totalorder %s723_s17, 3  ;;  %p1034_p1 = scmp.ge.s32.totalorder %s723_s17, 1 }
  0x38   : > { %s885_s5 = scalar_lea.hbm %s1013_s0, %s823_s30  ;;  %s166_s22 = scalar_lea.vmem [#allocation3], %s820_s29 }
  0x39   : > { %p877_p2 = pnand %p1034_p1, %p1033_p12  ;;  %s174_s23 = sshll.u32 %s166_s22, 4  ;;  %s888_s23 = int_to_ptr.vmem [resolvable:$true] %s174_s23 }
  0x3a   : > { %s894_s7 = scalar_lea.hbm %s1015_s2, %s823_s30  ;;  %s163_s1 = scalar_lea.sflag [#allocation4], %s162_s28 }
  0x3b   : > { %s1035_s19 = scalar_select %p877_p2, 1, 0 }
  0x3c   : > { %s577_s20 = scalar_lea.hbm %s885_s5, 128  ;;  %s582_s16 = scalar_lea.hbm %s1013_s0, 256 }
  0x3d   : > { %p578_p8 = scmp.ne.s32.totalorder %s885_s5, %s577_s20  ;;  %p583_p6 = scmp.lt.u32.totalorder %s885_s5, %s1013_s0 }
  0x3e   : > { %p584_p13 = scmp.lt.u32.totalorder %s582_s16, %s577_s20  ;;  %p586_p5 = scmp.lt.u32.totalorder %s577_s20, %s885_s5 }
  0x3f   : > { %p580_p9 = pnand %p578_p8, %p849_p4 }
  0x40   : > { %p585_p3 = por %p584_p13, %p583_p6 }
  0x41   : > { %p581_p11 = pneg %p580_p9 }
  0x42   : > { %p587_p7 = por %p586_p5, %p585_p3 }
  0x44   : > { %p588_p10 = pnand %p587_p7, %p581_p11 }
  0x46   : > { %591 = shalt.err (!%p588_p10)
}
  0x47   : > { %s592_s28 = scalar_lea.vmem %s888_s23, 128  ;;  %s726_s30 = smov [#allocation3]  }
  0x48   : > { %p593_p12 = scmp.ne.s32.totalorder %s888_s23, %s592_s28  ;;  %s597_s8 = sshll.u32 %s726_s30, 4  ;;  %s598_s8 = int_to_ptr.vmem [resolvable:$false] %s597_s8 }
  0x49   : > { %s599_s26 = scalar_lea.vmem %s598_s8, 256  ;;  %p600_p9 = scmp.lt.s32.totalorder %s888_s23, %s598_s8 }
  0x4a   : > { %p595_p1 = pnand %p593_p12, %p849_p4  ;;  %p601_p2 = scmp.lt.s32.totalorder %s599_s26, %s592_s28 }
  0x4c   : > { %p596_p8 = pneg %p595_p1  ;;  %p602_p6 = por %p601_p2, %p600_p9 }
  0x4e   : > { %p603_p13 = pnand %p602_p6, %p596_p8 }
  0x50   : > { %606 = shalt.err (!%p603_p13)
}
  0x51   : > { %486 = dma.hbm_to_vmem [thread:$0]  (!%p827_p0), %s885_s5, 128, %s888_s23, %s163_s1  }
  0x52   : > { %s204_s16 = scalar_lea.vmem [#allocation8], %s820_s29  ;;  %s607_s10 = scalar_lea.hbm %s894_s7, 128 }
  0x53   : > { %s212_s20 = sshll.u32 %s204_s16, 4  ;;  %p608_p11 = scmp.ne.s32.totalorder %s894_s7, %s607_s10  ;;  %s213_s20 = int_to_ptr.vmem [resolvable:$true] %s212_s20 }
  0x54   : > { %s612_s22 = scalar_lea.hbm %s1015_s2, 256  ;;  %p613_p5 = scmp.lt.u32.totalorder %s894_s7, %s1015_s2 }
  0x55   : > { %p610_p2 = pnand %p608_p11, %p849_p4  ;;  %p614_p7 = scmp.lt.u32.totalorder %s612_s22, %s607_s10 }
  0x56   : > { %p616_p12 = scmp.lt.u32.totalorder %s607_s10, %s894_s7 }
  0x57   : > { %p611_p3 = pneg %p610_p2  ;;  %p615_p10 = por %p614_p7, %p613_p5 }
  0x59   : > { %p617_p1 = por %p616_p12, %p615_p10 }
  0x5b   : > { %p618_p8 = pnand %p617_p1, %p611_p3 }
  0x5d   : > { %621 = shalt.err (!%p618_p8)
}
  0x5e   : > { %s622_s1 = scalar_lea.vmem %s213_s20, 128  ;;  %s727_s29 = smov [#allocation8]  }
  0x5f   : > { %p623_p9 = scmp.ne.s32.totalorder %s213_s20, %s622_s1  ;;  %s627_s5 = sshll.u32 %s727_s29, 4  ;;  %s628_s5 = int_to_ptr.vmem [resolvable:$false] %s627_s5 }
  0x60   : > { %s629_s23 = scalar_lea.vmem %s628_s5, 256  ;;  %p630_p11 = scmp.lt.s32.totalorder %s213_s20, %s628_s5 }
  0x61   : > { %p625_p6 = pnand %p623_p9, %p849_p4  ;;  %p631_p2 = scmp.lt.s32.totalorder %s629_s23, %s622_s1 }
  0x63   : > { %p626_p13 = pneg %p625_p6  ;;  %p632_p0 = por %p631_p2, %p630_p11 }
  0x65   : > { %p633_p5 = pnand %p632_p0, %p626_p13 }
  0x67   : > { %636 = shalt.err (!%p633_p5)
}
  0x68   : > { %p1036_p7 = scmp.ne.s32.totalorder %s1030_s4, 0  ;;  %p1037_p3 = scmp.ne.s32.totalorder %s1035_s19, 0 }
  0x69   : > { %s941_s21 = sand.u32 (!%p1037_p3), 1, %s707_s13   ;;  %p1038_p0 = scmp.ne.s32.totalorder (!%p1037_p3), %s1026_s24, 0 }
  0x6a   : > { %492 = dma.hbm_to_vmem [thread:$0]  (!%p1036_p7), %s894_s7, 128, %s213_s20, %s843_s11  }
  0x6b   : > { %221 = sbr.rel (%p1037_p3) target bundleno = 349 (0x15d), region = 32  ;;  %s944_s8 = sshll.u32 (!%p1037_p3), %s941_s21, 3 }
  0x6c   : > { %s224_s26 = scalar_lea.sflag (!%p1037_p3), [#allocation4], %s941_s21  ;;  %s227_s16 = scalar_lea.vmem (!%p1037_p3), [#allocation3], %s944_s8 }
  0x72   : > { %690 = dma.done.wait (%p1038_p0), %s224_s26, 128  }
  0x73   : > { %692 = vsyncadd (%p1038_p0), %s224_s26, 4294967168  ;;  %s232_s4 = sand.u32 1, %s780_s18   ;;  %s236_s19 = scalar_lea.vmem [#allocation6], %s944_s8 }
  0x74   : > { %s233_s11 = scalar_lea.sflag [#allocation7], %s232_s4 }
  0x75   : > { %694 = dma.done.wait (%p1038_p0), %s233_s11, 256  }
  0x76   : > { %696 = vsyncadd (%p1038_p0), %s233_s11, 4294967040  ;;  %v286_v0 = vld [vmem:[%s227_s16] sm:$0xff]  ;;  %v287_v1 = vld [vmem:[%s236_s19] sm:$0xff]  ;;  %s245_s7 = scalar_lea.vmem [#allocation8], %s944_s8  ;;  %s277_s18 = scalar_lea.vmem [#allocation9], %s944_s8 }
  0x77   : > { %v288_v2 = vsub.f32 %v286_v0, %v287_v1  ;;  %v296_v7 = vld [vmem:[%s245_s7] sm:$0xff]  ;;  %s329_s24 = sshll.u32 %s277_s18, 4  ;;  %s470_s20 = sshll.u32 %s715_s15, 7  ;;  %s961_s24 = int_to_ptr.vmem [resolvable:$true] %s329_s24 }
  0x78   : > { %s966_s22 = scalar_lea.hbm %s1016_s3, %s470_s20  ;;  %s316_s28 = scalar_lea.sflag [#allocation5], %s941_s21 }
  0x79   : > { %v289_v3 = vand.u32 2147483647, %v288_v2  ;;  %s637_s30 = scalar_lea.vmem %s961_s24, 128  ;;  %p1039_p10 = scmp.ne.s32.totalorder %s1027_s25, 0 }
  0x7a   : > { %p638_p4 = scmp.ne.s32.totalorder %s961_s24, %s637_s30  ;;  %s728_s15 = smov [#allocation9]  }
  0x7b   : > { %v291_v4 = vmul.f32 0.5, %v289_v3  ;;  %v468_v5 = vadd.f32 -0.5, %v289_v3  ;;  %vm290_vm0 = vcmp.lt.f32.partialorder %v289_v3, 1.0  ;;  %s641_s1 = sshll.u32 %s728_s15, 4  ;;  %s642_s1 = int_to_ptr.vmem [resolvable:$false] %s641_s1 }
  0x7c   : > { %p639_p12 = pnand %p638_p4, %p1039_p10  ;;  %s643_s29 = scalar_lea.vmem %s642_s1, 256 }
  0x7d   : > { %v292_v6 = vmul.f32 %v291_v4, %v289_v3  ;;  %p644_p8 = scmp.lt.s32.totalorder %s961_s24, %s642_s1  ;;  %p645_p9 = scmp.lt.s32.totalorder %s643_s29, %s637_s30 }
  0x7e   : > { %p640_p1 = pneg %p639_p12 }
  0x7f   : > { %v294_v8 = vsel %vm290_vm0, %v292_v6, %v468_v5  ;;  %p646_p6 = por %p645_p9, %p644_p8 }
  0x80   : > { %v297_v9 = vmul.f32 %v296_v7, %v294_v8 }
  0x81   : > { %p647_p13 = pnand %p646_p6, %p640_p1 }
  0x82   : > { %304 = vadd.xlane.f32.xlu0 %v297_v9 }
 0x10f   : > { %v305_v10 = vpop.xlane.xlu0 %304 }
 0x110   : > { %v306_v11 = vrot.slane %v305_v10, 4 }
 0x112   : > { %v307_v12 = vadd.f32 %v306_v11, %v305_v10 }
 0x114   : > { %v308_v13 = vrot.slane %v307_v12, 2 }
 0x116   : > { %v309_v14 = vadd.f32 %v308_v13, %v307_v12 }
 0x118   : > { %v310_v15 = vrot.slane %v309_v14, 1 }
 0x11a   : > { %v311_v16 = vadd.f32 %v310_v15, %v309_v14 }
 0x11c   : > { %473 = vpush %v311_v16 }
 0x14d   : > { %s474_s10 = spop %473 }
 0x14e   : > { %v313_v17 = vstv %s474_s10 }
 0x14f   : > { %314 = vst [vmem:[%s277_s18] sm:$0xff] %v313_v17 }
 0x150   : > { %650 = shalt.err (!%p647_p13)
}
 0x151   : > { %s651_s5 = scalar_lea.hbm %s966_s22, 128  ;;  %s655_s8 = scalar_lea.hbm %s1016_s3, 256 }
 0x152   : > { %p652_p11 = scmp.ne.s32.totalorder %s966_s22, %s651_s5  ;;  %p656_p7 = scmp.lt.u32.totalorder %s966_s22, %s1016_s3 }
 0x153   : > { %p657_p3 = scmp.lt.u32.totalorder %s655_s8, %s651_s5  ;;  %p659_p4 = scmp.lt.u32.totalorder %s651_s5, %s966_s22 }
 0x154   : > { %p653_p2 = pnand %p652_p11, %p1039_p10 }
 0x155   : > { %p658_p0 = por %p657_p3, %p656_p7 }
 0x156   : > { %p654_p5 = pneg %p653_p2 }
 0x157   : > { %p660_p12 = por %p659_p4, %p658_p0 }
 0x159   : > { %p661_p1 = pnand %p660_p12, %p654_p5 }
 0x15b   : > { %664 = shalt.err (!%p661_p1)
}
 0x15c   : > { %481 = dma.vmem_to_hbm [thread:$0]  (%p1039_p10), %s961_s24, 128, %s966_s22, %s316_s28  }
 0x15d PF: > { %s341_s4 = sand.u32 1, %s703_s12   ;;  %p1040_p8 = scmp.ne.s32.totalorder %s1029_s27, 0 }
 0x15e   : > { %p1041_p9 = scmp.ge.s32.totalorder %s723_s17, 2  ;;  %s342_s11 = scalar_lea.sflag [#allocation5], %s341_s4 }
 0x160   : > { %p494_p6 = pnand %p1041_p9, %p1040_p8 }
 0x162   : > { %698 = dma.done.wait (!%p494_p6), %s342_s11, 128  }
 0x163   : > { %700 = vsyncadd (!%p494_p6), %s342_s11, 4294967168  ;;  %s22_s17 = sadd.s32 1, %s723_s17   ;;  %s1042_s25 = sld [smem:[#allocation15_spill]] }
 0x164   : > { %p19_p13 = scmp.ge.s32.totalorder %s22_s17, 4   ;;  %s1043_s15 = sld [smem:[#allocation13_spill]] }
 0x165   : > { %s1044_s16 = sld [smem:[#allocation14_spill]]  ;;  %s1045_s12 = smov %s707_s13 }
 0x166   : > { %s1046_s13 = smov %s711_s14  ;;  %21 = sbr.rel (!%p19_p13) target bundleno = 10 (0xa), region = 109 }
 0x169   : > { %s1047_s14 = smov %s1042_s25 }
 0x16d   :  { %347 = vsyncpa [#allocation4], 1 }
 0x16e   :  { %349 = vsyncpa [#allocation4 + $0x1], 1 }
 0x16f   :  { %350 = vsyncpa [#allocation7], 1 }
 0x170   :  { %352 = vsyncpa [#allocation7 + $0x1], 1 }
 0x171   :  { %353 = vsyncpa [#allocation5], 1 }
 0x172   :  { %355 = vsyncpa [#allocation5 + $0x1], 1 }

</bundles_post_ra>
